<compile_context>
chip_gen: v6e
topology: v6e:2x2x1
jax: 0.10.0
libtpu: 0.0.40
codegen_flags: <defaults>
</compile_context>

<pallas_src>
import functools

import jax
import jax.numpy as jnp
from jax.experimental import pallas as pl
from jax.experimental.pallas import tpu as pltpu

_H = 64           # per-network hidden / output width
_HW = 2 * _H      # fused lane width (128)


def _round_up(x, m):
    return ((x + m - 1) // m) * m


def _vmem_capacity_bytes():
    """Per-core VMEM capacity; conservative v7x value (64 MiB) if the query fails."""
    try:
        return int(pltpu.get_tpu_info().vmem_capacity_bytes)
    except Exception:
        return 64 << 20


def _choose_batch_tile(b_pad, feat, vmem_cap):
    """Pick the largest sublane-aligned batch tile that fits the VMEM budget."""
    # Weights/biases are resident (default double-buffered) regardless of TB.
    weight_bytes = 2 * (feat * _HW + _HW + _HW * _HW + _HW) * 4
    headroom = 8 << 20
    budget = int(vmem_cap * 0.75) - weight_bytes - headroom
    per_row = 2 * (feat + _HW) * 4            # double-buffered f32 x row + out row
    tb_cap = max(8, (budget // per_row) // 8 * 8) if budget > 0 else 8
    tb = min(2048, b_pad, tb_cap)
    # v7x has 2 TensorCores: make sure moderate batches produce >= 2 grid steps so the
    # "parallel" batch axis actually uses both cores. Cheap on single-core chips.
    if b_pad >= 16:
        tb = min(tb, _round_up(pl.cdiv(b_pad, 2), 8))
    return max(8, tb)


def _mlp_extractor_kernel(x_ref, w1_ref, b1_ref, w2_ref, b2_ref, out_ref, *, mxu_dtype):
    # x: [TB, F]   w1: [F, 128]   w2: [128, 128] (block-diag)   out: [TB, 128]
    x = x_ref[...]
    w1 = w1_ref[...]
    w2 = w2_ref[...]
    if mxu_dtype != jnp.float32:
        # bf16 operands, f32 accumulate: native MXU rate on v6e/v7x.
        x = x.astype(mxu_dtype)
        w1 = w1.astype(mxu_dtype)
        w2 = w2.astype(mxu_dtype)
    # Layer 1 (policy | value fused along lanes). Bias add + tanh stay f32 (v5e-safe).
    h = jnp.tanh(jnp.dot(x, w1, preferred_element_type=jnp.float32) + b1_ref[...])
    h_in = h.astype(mxu_dtype) if mxu_dtype != jnp.float32 else h
    # Layer 2: block-diagonal [128,128] keeps the two nets independent.
    y = jnp.tanh(jnp.dot(h_in, w2, preferred_element_type=jnp.float32) + b2_ref[...])
    out_ref[...] = y.astype(out_ref.dtype)


def mlp_extractor(features, packed, *, mxu_dtype=jnp.float32):
    """features: [B, F] float32; packed: dict from pack_params().

    Returns (latent_pi [B,64], latent_vf [B,64]), both float32.
    """
    B, F = features.shape

    # Pad batch only to the sublane multiple (8); the ragged last grid block is masked.
    B_pad = _round_up(B, 8)
    if B_pad != B:
        features = jnp.pad(features, ((0, B_pad - B), (0, 0)))

    vmem_cap = _vmem_capacity_bytes()
    TB = _choose_batch_tile(B_pad, F, vmem_cap)
    grid = (pl.cdiv(B_pad, TB),)

    # Explicit VMEM budget: double-buffered x/out tiles + resident weights + headroom,
    # clamped below the physical per-core capacity.
    x_bytes = TB * F * 4
    out_bytes = TB * _HW * 4
    weight_bytes = (F * _HW + _HW + _HW * _HW + _HW) * 4
    vmem_limit = min(int(0.9 * vmem_cap),
                     2 * (x_bytes + out_bytes) + 2 * weight_bytes + (4 << 20))

    cost = pl.CostEstimate(
        flops=2 * B_pad * (F * _HW + _HW * _HW),
        transcendentals=2 * B_pad * _HW,
        bytes_accessed=B_pad * F * 4 + weight_bytes + B_pad * _HW * 4,
    )

    kernel = functools.partial(_mlp_extractor_kernel, mxu_dtype=mxu_dtype)

    out = pl.pallas_call(
        kernel,
        out_shape=jax.ShapeDtypeStruct((B_pad, _HW), jnp.float32),
        grid_spec=pltpu.PrefetchScalarGridSpec(
            num_scalar_prefetch=0,
            grid=grid,
            in_specs=[
                pl.BlockSpec((TB, F), lambda i: (i, 0)),        # x tile (pipelined)
                pl.BlockSpec((F, _HW), lambda i: (0, 0)),       # fused W1 (resident)
                pl.BlockSpec((1, _HW), lambda i: (0, 0)),       # fused b1 (resident)
                pl.BlockSpec((_HW, _HW), lambda i: (0, 0)),     # block-diag W2 (resident)
                pl.BlockSpec((1, _HW), lambda i: (0, 0)),       # fused b2 (resident)
            ],
            out_specs=pl.BlockSpec((TB, _HW), lambda i: (i, 0)),
        ),
        compiler_params=pltpu.CompilerParams(
            dimension_semantics=("parallel",),
            vmem_limit_bytes=int(vmem_limit),
        ),
        cost_estimate=cost,
    )(features, packed["w1"], packed["b1"], packed["w2"], packed["b2"])

    latent_pi = out[:B, :_H]
    latent_vf = out[:B, _H:]
    return latent_pi, latent_vf


def init_params(key, feature_dim, hidden=_H):
    """PyTorch-style init: U(-1/sqrt(fan_in), 1/sqrt(fan_in)).

    Weights stored as [in, out] (transpose of nn.Linear.weight); biases as [1, out].
    """
    keys = jax.random.split(key, 8)

    def lin(kw, kb, fan_in, fan_out):
        bound = 1.0 / jnp.sqrt(jnp.float32(fan_in))
        w = jax.random.uniform(kw, (fan_in, fan_out), jnp.float32, -bound, bound)
        b = jax.random.uniform(kb, (1, fan_out), jnp.float32, -bound, bound)
        return w, b

    w1p, b1p = lin(keys[0], keys[1], feature_dim, hidden)
    w2p, b2p = lin(keys[2], keys[3], hidden, hidden)
    w1v, b1v = lin(keys[4], keys[5], feature_dim, hidden)
    w2v, b2v = lin(keys[6], keys[7], hidden, hidden)
    return dict(w1p=w1p, b1p=b1p, w2p=w2p, b2p=b2p,
                w1v=w1v, b1v=b1v, w2v=w2v, b2v=b2v)


def pack_params(p):
    """Pack once (not per call): fused first layer + block-diagonal second layer."""
    hidden = p["w2p"].shape[0]
    w1 = jnp.concatenate([p["w1p"], p["w1v"]], axis=1)            # [F, 128]
    b1 = jnp.concatenate([p["b1p"], p["b1v"]], axis=1)            # [1, 128]
    z = jnp.zeros((hidden, hidden), jnp.float32)
    w2 = jnp.block([[p["w2p"], z], [z, p["w2v"]]])                # [128, 128] block-diag
    b2 = jnp.concatenate([p["b2p"], p["b2v"]], axis=1)            # [1, 128]
    return dict(w1=w1, b1=b1, w2=w2, b2=b2)


def _reference(features, p):
    h_pi = jnp.tanh(features @ p["w1p"] + p["b1p"])
    pi = jnp.tanh(h_pi @ p["w2p"] + p["b2p"])
    h_vf = jnp.tanh(features @ p["w1v"] + p["b1v"])
    vf = jnp.tanh(h_vf @ p["w2v"] + p["b2v"])
    return pi, vf


if __name__ == "__main__":
    key = jax.random.PRNGKey(0)
    k_x, k_p, k_x2 = jax.random.split(key, 3)

    feature_dim = 32
    params = init_params(k_p, feature_dim)
    packed = pack_params(params)

    # Case 1: small batch, single grid step, exact f32 path.
    batch = 8
    features = jax.random.normal(k_x, (batch, feature_dim), jnp.float32)
    latent_pi, latent_vf = mlp_extractor(features, packed)
    jax.block_until_ready((latent_pi, latent_vf))
    ref_pi, ref_vf = _reference(features, params)
    assert latent_pi.shape == (batch, 64) and latent_vf.shape == (batch, 64)
    assert jnp.allclose(latent_pi, ref_pi, atol=1e-5, rtol=1e-5)
    assert jnp.allclose(latent_vf, ref_vf, atol=1e-5, rtol=1e-5)

    # Case 2: ragged batch (exercises cdiv grid + masked last block + >=2 grid steps).
    batch2 = 20
    features2 = jax.random.normal(k_x2, (batch2, feature_dim), jnp.float32)
    pi2, vf2 = mlp_extractor(features2, packed)
    jax.block_until_ready((pi2, vf2))
    ref_pi2, ref_vf2 = _reference(features2, params)
    assert pi2.shape == (batch2, 64) and vf2.shape == (batch2, 64)
    assert jnp.allclose(pi2, ref_pi2, atol=1e-5, rtol=1e-5)
    assert jnp.allclose(vf2, ref_vf2, atol=1e-5, rtol=1e-5)

    # Case 3: bf16-operand / f32-accumulate MXU path (v6e/v7x lever); relaxed tolerance.
    pi_bf, vf_bf = mlp_extractor(features2, packed, mxu_dtype=jnp.bfloat16)
    jax.block_until_ready((pi_bf, vf_bf))
    assert jnp.allclose(pi_bf, ref_pi2, atol=2e-2, rtol=2e-2)
    assert jnp.allclose(vf_bf, ref_vf2, atol=2e-2, rtol=2e-2)

    print("KERNEL_OK")
</pallas_src>

<mosaic_0001>
module attributes {stable_mosaic.version = 11 : i64} {
  func.func @_mlp_extractor_kernel(%arg0: i32, %arg1: memref<8x32xf32, #tpu.memory_space<vmem>>, %arg2: memref<32x128xf32, #tpu.memory_space<vmem>>, %arg3: memref<1x128xf32, #tpu.memory_space<vmem>>, %arg4: memref<128x128xf32, #tpu.memory_space<vmem>>, %arg5: memref<1x128xf32, #tpu.memory_space<vmem>>, %arg6: memref<8x128xf32, #tpu.memory_space<vmem>>) attributes {dimension_semantics = [#tpu.dimension_semantics<parallel>], iteration_bounds = array<i64: 1>, scalar_prefetch = 0 : i64, scratch_operands = 0 : i64, tpu.core_type = #tpu.core_type<tc>, window_params = [{transform_indices = @transform_0, window_bounds = array<i64: 8, 32>}, {pipeline_mode = #tpu.pipeline_mode<synchronous>, transform_indices = @transform_1, window_bounds = array<i64: 32, 128>}, {pipeline_mode = #tpu.pipeline_mode<synchronous>, transform_indices = @transform_2, window_bounds = array<i64: 1, 128>}, {pipeline_mode = #tpu.pipeline_mode<synchronous>, transform_indices = @transform_3, window_bounds = array<i64: 128, 128>}, {pipeline_mode = #tpu.pipeline_mode<synchronous>, transform_indices = @transform_4, window_bounds = array<i64: 1, 128>}, {transform_indices = @transform_5, window_bounds = array<i64: 8, 128>}]} {
    %c0 = arith.constant 0 : index
    %c0_0 = arith.constant 0 : index
    %0 = vector.load %arg1[%c0, %c0_0] : memref<8x32xf32, #tpu.memory_space<vmem>>, vector<8x32xf32>
    %c0_1 = arith.constant 0 : index
    %c0_2 = arith.constant 0 : index
    %1 = vector.load %arg2[%c0_1, %c0_2] : memref<32x128xf32, #tpu.memory_space<vmem>>, vector<32x128xf32>
    %c0_3 = arith.constant 0 : index
    %c0_4 = arith.constant 0 : index
    %2 = vector.load %arg4[%c0_3, %c0_4] : memref<128x128xf32, #tpu.memory_space<vmem>>, vector<128x128xf32>
    %cst = arith.constant dense<0.000000e+00> : vector<8x128xf32>
    %3 = tpu.matmul %0, %1, %cst {dimension_numbers = #tpu.dot_dimension_numbers<[1], [0], [0], [1], [0, 0, 1, 1], [], []>} : vector<8x32xf32>, vector<32x128xf32>, vector<8x128xf32> -> vector<8x128xf32>
    %c0_5 = arith.constant 0 : index
    %c0_6 = arith.constant 0 : index
    %4 = vector.load %arg3[%c0_5, %c0_6] : memref<1x128xf32, #tpu.memory_space<vmem>>, vector<1x128xf32>
    %5 = vector.broadcast %4 : vector<1x128xf32> to vector<8x128xf32>
    %6 = arith.addf %3, %5 : vector<8x128xf32>
    %7 = math.tanh %6 : vector<8x128xf32>
    %cst_7 = arith.constant dense<0.000000e+00> : vector<8x128xf32>
    %8 = tpu.matmul %7, %2, %cst_7 {dimension_numbers = #tpu.dot_dimension_numbers<[1], [0], [0], [1], [0, 0, 1, 1], [], []>} : vector<8x128xf32>, vector<128x128xf32>, vector<8x128xf32> -> vector<8x128xf32>
    %c0_8 = arith.constant 0 : index
    %c0_9 = arith.constant 0 : index
    %9 = vector.load %arg5[%c0_8, %c0_9] : memref<1x128xf32, #tpu.memory_space<vmem>>, vector<1x128xf32>
    %10 = vector.broadcast %9 : vector<1x128xf32> to vector<8x128xf32>
    %11 = arith.addf %8, %10 : vector<8x128xf32>
    %12 = math.tanh %11 : vector<8x128xf32>
    %c0_10 = arith.constant 0 : index
    %c0_11 = arith.constant 0 : index
    %13 = vector.load %arg6[%c0_10, %c0_11] : memref<8x128xf32, #tpu.memory_space<vmem>>, vector<8x128xf32>
    tpu.vector_store %arg6[%c0_10, %c0_11], %12 {strides = array<i32>} : memref<8x128xf32, #tpu.memory_space<vmem>>, vector<8x128xf32>,
    return
  }
  func.func @transform_0(%arg0: i32) -> (i32, i32) {
    %c0_i32 = arith.constant 0 : i32
    %c0_i32_0 = arith.constant 0 : i32
    return %arg0, %c0_i32 : i32, i32
  }
  func.func @transform_1(%arg0: i32) -> (i32, i32) {
    %c0_i32 = arith.constant 0 : i32
    %c0_i32_0 = arith.constant 0 : i32
    %c0_i32_1 = arith.constant 0 : i32
    return %c0_i32, %c0_i32_0 : i32, i32
  }
  func.func @transform_2(%arg0: i32) -> (i32, i32) {
    %c0_i32 = arith.constant 0 : i32
    %c0_i32_0 = arith.constant 0 : i32
    %c0_i32_1 = arith.constant 0 : i32
    return %c0_i32, %c0_i32_0 : i32, i32
  }
  func.func @transform_3(%arg0: i32) -> (i32, i32) {
    %c0_i32 = arith.constant 0 : i32
    %c0_i32_0 = arith.constant 0 : i32
    %c0_i32_1 = arith.constant 0 : i32
    return %c0_i32, %c0_i32_0 : i32, i32
  }
  func.func @transform_4(%arg0: i32) -> (i32, i32) {
    %c0_i32 = arith.constant 0 : i32
    %c0_i32_0 = arith.constant 0 : i32
    %c0_i32_1 = arith.constant 0 : i32
    return %c0_i32, %c0_i32_0 : i32, i32
  }
  func.func @transform_5(%arg0: i32) -> (i32, i32) {
    %c0_i32 = arith.constant 0 : i32
    %c0_i32_0 = arith.constant 0 : i32
    return %arg0, %c0_i32 : i32, i32
  }
}

</mosaic_0001>

<bundles_post_ra>
// kernel: tpu_custom_call.1
= control target key start
LH: loop header
LB: loop body
LE: loop exit
PB: predicated region body
PF: predicated region fallthrough
CT: control target
= control target key end

     0   :  { %10 = vsyncpa [#allocation3], 0  ;;  %s505_s0 = inlined_call_operand.hbm [shape: f32[8,32], index: 0, kind: input, shape index: {}]   ;;  %s506_s1 = inlined_call_operand.hbm [shape: f32[32,128], index: 1, kind: input, shape index: {}]   ;;  %s507_s2 = inlined_call_operand.vmem [shape: f32[1,128], index: 2, kind: input, shape index: {}]   ;;  %s508_s3 = inlined_call_operand.hbm [shape: f32[128,128], index: 3, kind: input, shape index: {}]   ;;  %s509_s4 = inlined_call_operand.vmem [shape: f32[1,128], index: 4, kind: input, shape index: {}]   ;;  %s510_s5 = inlined_call_operand.hbm [shape: f32[8,128], index: 5, kind: output, shape index: {}]  }
   0x1   :  { %11 = vsyncpa [#allocation6], 0 }
   0x2   :  { %12 = vsyncpa [#allocation4], 0  ;;  %s427_s18 = smov [#allocation5]  }
   0x3   :  { %s28_s19 = sshll.u32 %s427_s18, 4  ;;  %s29_s19 = int_to_ptr.vmem [resolvable:$true] %s28_s19 }
   0x4   :  { %s349_s20 = scalar_lea.vmem %s29_s19, 512  ;;  %p354_p1 = scmp.lt.s32.totalorder %s29_s19, %s29_s19 }
   0x5   :  { %p350_p0 = scmp.ne.s32.totalorder %s29_s19, %s349_s20  ;;  %p355_p2 = scmp.lt.s32.totalorder %s349_s20, %s349_s20 }
   0x7   :  { %p356_p3 = por %p355_p2, %p354_p1 }
   0x9   :  { %p357_p4 = pnand %p356_p3, %p350_p0 }
   0xb   :  { %360 = shalt.err (!%p357_p4)
}
   0xc   :  { %s428_s21 = smov 128   ;;  %s429_s22 = smov 8  }
   0xd   :  { %34 = dma.hbm_to_vmem [thread:$0]  %s506_s1, 512, %s29_s19, [#allocation6], %s428_s21, %s428_s21, %s429_s22  }
   0xe   :  { %s430_s25 = smov [#allocation2]   ;;  %s431_s27 = smov [#allocation7]  }
   0xf   :  { %s19_s26 = sshll.u32 %s430_s25, 4  ;;  %s42_s28 = sshll.u32 %s431_s27, 4  ;;  %s20_s26 = int_to_ptr.vmem [resolvable:$true] %s19_s26  ;;  %s43_s28 = int_to_ptr.vmem [resolvable:$true] %s42_s28 }
  0x10   :  { %s369_s29 = scalar_lea.vmem %s20_s26, 128  ;;  %p374_p6 = scmp.lt.s32.totalorder %s20_s26, %s20_s26 }
  0x11   :  { %p370_p5 = scmp.ne.s32.totalorder %s20_s26, %s369_s29  ;;  %p375_p7 = scmp.lt.s32.totalorder %s369_s29, %s369_s29 }
  0x13   :  { %p376_p8 = por %p375_p7, %p374_p6 }
  0x15   :  { %p377_p9 = pnand %p376_p8, %p370_p5 }
  0x17   :  { %380 = shalt.err (!%p377_p9)
}
  0x18   :  { %22 = dma.hbm_to_vmem [thread:$0]  %s505_s0, 128, %s20_s26, [#allocation3]  }
  0x19   :  { %s389_s7 = scalar_lea.vmem %s43_s28, 2048  ;;  %p394_p11 = scmp.lt.s32.totalorder %s43_s28, %s43_s28 }
  0x1a   :  { %p390_p10 = scmp.ne.s32.totalorder %s43_s28, %s389_s7  ;;  %p395_p12 = scmp.lt.s32.totalorder %s389_s7, %s389_s7 }
  0x1c   :  { %p396_p13 = por %p395_p12, %p394_p11 }
  0x1e   :  { %p397_p0 = pnand %p396_p13, %p390_p10 }
  0x20   :  { %400 = shalt.err (!%p397_p0)
}
  0x21   :  { %48 = dma.hbm_to_vmem [thread:$0]  %s508_s3, 2048, %s43_s28, [#allocation6], %s428_s21, %s428_s21, %s429_s22  }
  0x22   :  { %421 = dma.done.wait [#allocation3], 128  }
  0x23   :  { %422 = vsyncadd [#allocation3], 4294967168 }
  0x24   :  { %423 = dma.done.wait [#allocation6], 2560  }
  0x25   :  { %424 = vsyncadd [#allocation6], 4294964736  ;;  %v432_v0 = vmov 0.0   ;;  %vm433_vm0 = vmmov 0   ;;  %v64_v1 = vld [vmem:[#allocation5 + $0x18] sm:$0xff]  ;;  %v63_v2 = vld [vmem:[#allocation5 + $0x10] sm:$0xff] }
  0x26   :  { %283 = vmatprep.subr.mxu0 %v432_v0  ;;  %291 = vmatprep.mubr.msk.f32.mxu0 %vm433_vm0, %v432_v0  ;;  %v80_v3 = vld [vmem:[#allocation7 + $0x78] sm:$0xff]  ;;  %v62_v4 = vld [vmem:[#allocation5 + $0x8] sm:$0xff]  ;;  %v79_v5 = vld [vmem:[#allocation7 + $0x70] sm:$0xff]  ;;  %vm88_vm1 = vcmask 261120   ;;  %s434_s11 = smov [#allocation8]  }
  0x27   :  { %294 = vmatprep.subr.mxu1 %v432_v0  ;;  %326 = vmatprep.mubr.msk.f32.mxu1 %vm433_vm0, %v432_v0  ;;  %v78_v6 = vld [vmem:[#allocation7 + $0x68] sm:$0xff]  ;;  %v61_v7 = vld [vmem:[#allocation5] sm:$0xff]  ;;  %v60_v8 = vld [vmem:[#allocation2] sm:$0xff]  ;;  %s248_s12 = sshll.u32 %s434_s11, 4  ;;  %s249_s12 = int_to_ptr.vmem [resolvable:$true] %s248_s12 }
  0x28   :  { %284 = vmatpush3.msra.mxu0 %v64_v1  ;;  %295 = vmatpush3.msra.mxu1 %v80_v3  ;;  %v77_v9 = vld [vmem:[#allocation7 + $0x60] sm:$0xff]  ;;  %v76_v10 = vld [vmem:[#allocation7 + $0x58] sm:$0xff]  ;;  %v75_v11 = vld [vmem:[#allocation7 + $0x50] sm:$0xff]  ;;  %p406_p2 = scmp.lt.s32.totalorder %s249_s12, %s249_s12 }
  0x29   :  { %285 = vmatprep.subr.mxu0 %v432_v0  ;;  %296 = vmatprep.subr.mxu1 %v432_v0  ;;  %v74_v12 = vld [vmem:[#allocation7 + $0x48] sm:$0xff]  ;;  %v73_v13 = vld [vmem:[#allocation7 + $0x40] sm:$0xff]  ;;  %v72_v14 = vld [vmem:[#allocation7 + $0x38] sm:$0xff] }
  0x2a   :  { %286 = vmatpush3.msra.mxu0 %v63_v2  ;;  %297 = vmatpush3.msra.mxu1 %v79_v5  ;;  %v71_v15 = vld [vmem:[#allocation7 + $0x30] sm:$0xff]  ;;  %v70_v16 = vld [vmem:[#allocation7 + $0x28] sm:$0xff]  ;;  %v69_v17 = vld [vmem:[#allocation7 + $0x20] sm:$0xff] }
  0x2b   :  { %287 = vmatprep.subr.mxu0 %v432_v0  ;;  %298 = vmatprep.subr.mxu1 %v432_v0  ;;  %v68_v18 = vld [vmem:[#allocation7 + $0x18] sm:$0xff]  ;;  %v67_v19 = vld [vmem:[#allocation7 + $0x10] sm:$0xff]  ;;  %v66_v20 = vld [vmem:[#allocation7 + $0x8] sm:$0xff] }
  0x2c   :  { %288 = vmatpush3.msra.mxu0 %v62_v4  ;;  %299 = vmatpush3.msra.mxu1 %v78_v6  ;;  %v65_v21 = vld [vmem:[#allocation7] sm:$0xff]  ;;  %v258_v22 = vld [vmem:[%s507_s2] ss:$0 sm:$0xff]  ;;  %s401_s2 = scalar_lea.vmem %s249_s12, 128 }
  0x2d   :  { %289 = vmatprep.subr.mxu0 %v432_v0  ;;  %300 = vmatprep.subr.mxu1 %v432_v0  ;;  %v260_v27 = vld [vmem:[%s509_s4] ss:$0 sm:$0xff]  ;;  %p402_p1 = scmp.ne.s32.totalorder %s249_s12, %s401_s2  ;;  %p407_p3 = scmp.lt.s32.totalorder %s401_s2, %s401_s2 }
  0x2e   :  { %290 = vmatpush3.msra.mxu0 %v61_v7  ;;  %301 = vmatpush3.msra.mxu1 %v77_v9 }
  0x2f   :  { %292 = vmatmul.mubr.msk.f32.vlgmr.msra.gmra.mxu0 %vm88_vm1, %v60_v8  ;;  %302 = vmatprep.subr.mxu1 %v432_v0  ;;  %p408_p4 = por %p407_p3, %p406_p2 }
  0x30   :  { %303 = vmatpush3.msra.mxu1 %v76_v10 }
  0x31   :  { %304 = vmatprep.subr.mxu1 %v432_v0  ;;  %p409_p5 = pnand %p408_p4, %p402_p1 }
  0x32   :  { %305 = vmatpush3.msra.mxu1 %v75_v11 }
  0x33   :  { %306 = vmatprep.subr.mxu1 %v432_v0 }
  0x34   :  { %307 = vmatpush3.msra.mxu1 %v74_v12 }
  0x35   :  { %308 = vmatprep.subr.mxu1 %v432_v0 }
  0x36   :  { %309 = vmatpush3.msra.mxu1 %v73_v13 }
  0x37   :  { %310 = vmatprep.subr.mxu1 %v432_v0 }
  0x38   :  { %311 = vmatpush3.msra.mxu1 %v72_v14 }
  0x39   :  { %312 = vmatprep.subr.mxu1 %v432_v0 }
  0x3a   :  { %313 = vmatpush3.msra.mxu1 %v71_v15 }
  0x3b   :  { %314 = vmatprep.subr.mxu1 %v432_v0 }
  0x3c   :  { %315 = vmatpush3.msra.mxu1 %v70_v16 }
  0x3d   :  { %316 = vmatprep.subr.mxu1 %v432_v0 }
  0x3e   :  { %317 = vmatpush3.msra.mxu1 %v69_v17 }
  0x3f   :  { %318 = vmatprep.subr.mxu1 %v432_v0 }
  0x40   :  { %319 = vmatpush3.msra.mxu1 %v68_v18 }
  0x41   :  { %320 = vmatprep.subr.mxu1 %v432_v0 }
  0x42   :  { %321 = vmatpush3.msra.mxu1 %v67_v19 }
  0x43   :  { %322 = vmatprep.subr.mxu1 %v432_v0 }
  0x44   :  { %323 = vmatpush3.msra.mxu1 %v66_v20 }
  0x45   :  { %324 = vmatprep.subr.mxu1 %v432_v0 }
  0x46   :  { %325 = vmatpush3.msra.mxu1 %v65_v21 }
  0xef   :  { %v158_v23 = vpop.f32.mrf.mxu0 }
  0xf0   :  { %v159_v24 = vadd.f32 %v258_v22, %v158_v23 }
  0xf1   :  { %v293_v25 = vpop.f32.mrf.mxu0 }
  0xf2   :  { %337 = vtanh.f32 %v159_v24 }
  0xff   :  { %v338_v26 = vpop.eup %337 }
 0x100   :  { %327 = vmatmul.mubr.f32.vlgmr.msra.gmra.mxu1 %v338_v26 }
 0x1c0   :  { %v236_v28 = vpop.f32.mrf.mxu1 }
 0x1c1   :  { %v237_v29 = vadd.f32 %v260_v27, %v236_v28 }
 0x1c2   :  { %v328_v30 = vpop.f32.mrf.mxu1 }
 0x1c3   :  { %339 = vtanh.f32 %v237_v29 }
 0x1d0   :  { %v340_v31 = vpop.eup %339 }
 0x1d1   :  { %241 = vst [vmem:[#allocation8] sm:$0xff] %v340_v31 }
 0x1d2   :  { %412 = shalt.err (!%p409_p5)
}
 0x1d3   :  { %251 = dma.vmem_to_hbm [thread:$0]  %s249_s12, 128, %s510_s5, [#allocation4]  }
 0x1d4   :  { %425 = dma.done.wait [#allocation4], 128  }
 0x1d5   :  { %426 = vsyncadd [#allocation4], 4294967168 }
 0x1d6   :  { %255 = vsyncpa [#allocation3], 1 }
 0x1d7   :  { %256 = vsyncpa [#allocation6], 1 }
 0x1d8   :  { %257 = vsyncpa [#allocation4], 1 }

</bundles_post_ra>
